<compile_context>
chip_gen: v7x
topology: tpu7x:2x2x1
jax: 0.10.0
libtpu: 0.0.40
codegen_flags: <defaults>
</compile_context>

<pallas_src>
import functools

import jax
import jax.numpy as jnp
from jax import lax
from jax.experimental import pallas as pl
from jax.experimental.pallas import tpu as pltpu

IGNORE_INDEX = 255
RATIO = 0.2
_LANES = 128


def _log_sigmoid(x):
    # Numerically stable log(sigmoid(x)) built only from exp/log/min/abs so it
    # lowers cleanly in Mosaic; stays finite even when x saturates.
    return jnp.minimum(x, 0.0) - jnp.log(1.0 + jnp.exp(-jnp.abs(x)))


def _joint_nll_kernel(cls_ref, bin_ref, tgt_ref, out_ref):
    """Per-pixel joint NLL.

    cls_ref: (1, C, R, 128) class logits
    bin_ref: (1, 1, R, 128) binary (foreground) logit
    tgt_ref: (1, 1, R, 128) int32 labels
    out_ref: (1, R, 128)    f32 per-pixel loss (0 where ignored)
    """
    C = cls_ref.shape[1]
    b = bin_ref[0, 0].astype(jnp.float32)          # (R, 128)
    tgt = tgt_ref[0, 0]                            # (R, 128) int32

    # Channel max via a static unrolled loop (pure VPU elementwise, no XLU).
    m = cls_ref[0, 0].astype(jnp.float32)
    for c in range(1, C):
        m = jnp.maximum(m, cls_ref[0, c].astype(jnp.float32))

    # Foreground / background factors and their logs (numerically stable).
    log_fg = _log_sigmoid(b)                       # log sigmoid(b)
    log_bg = _log_sigmoid(-b)                      # log (1 - sigmoid(b))
    fg = jnp.exp(log_fg)
    bg = jnp.exp(log_bg)

    # The class-softmax normalizer cancels in p_ci = e*factor / sum(e*factor):
    #   log p[tgt] = (l_tgt - m) + log(factor_tgt)
    #                - log(bg*exp(l0 - m) + fg*sum_{c>0} exp(lc - m))
    l0 = cls_ref[0, 0].astype(jnp.float32)
    e0 = jnp.exp(l0 - m)
    erest = jnp.zeros_like(m)
    tgt_logit = jnp.where(tgt == 0, l0, 0.0)
    for c in range(1, C):
        lc = cls_ref[0, c].astype(jnp.float32)
        erest = erest + jnp.exp(lc - m)
        tgt_logit = jnp.where(tgt == c, lc, tgt_logit)
    s = bg * e0 + fg * erest

    log_factor_tgt = jnp.where(tgt == 0, log_bg, log_fg)
    log_p_tgt = (tgt_logit - m) + log_factor_tgt - jnp.log(s)

    valid = (tgt != IGNORE_INDEX) & (tgt >= 0) & (tgt < C)
    # Clamp tiny negative rounding residue so losses are guaranteed >= 0
    # (required by the bit-pattern bisection in the wrapper).
    out_ref[0] = jnp.where(valid, jnp.maximum(-log_p_tgt, 0.0), 0.0)


def _kth_largest(x, k):
    """Exact k-th largest value of a nonnegative f32 vector (k >= 1).

    Bisection over the f32 bit pattern: for nonnegative floats, integer order
    equals value order, so ~33 cheap streaming count passes find the k-th
    largest exactly (no sort / top_k).
    """
    max_bits = lax.bitcast_convert_type(jnp.max(x), jnp.int32)

    def body(_, carry):
        lo, hi = carry
        mid = lo + (hi - lo + 1) // 2
        thresh = lax.bitcast_convert_type(mid, jnp.float32)
        ok = jnp.sum((x >= thresh).astype(jnp.int32)) >= k
        return jnp.where(ok, mid, lo), jnp.where(ok, hi, mid - 1)

    lo, _ = lax.fori_loop(0, 33, body, (jnp.int32(0), max_bits))
    return lax.bitcast_convert_type(lo, jnp.float32)


@functools.partial(jax.jit, static_argnames=("ratio",))
def joint_loss_som(cls_pred, binary_pred, cls_true, ratio=RATIO):
    """cls_pred (N,C,H,W), binary_pred (N,1,H,W), cls_true (N,H,W) int."""
    N, C, H, W = cls_pred.shape
    HW = H * W
    rows = -(-HW // _LANES)                      # ceil-div: 128-lane rows

    # Row-tile size: target ~2 MiB of class logits per grid step, multiple of 8,
    # capped at 1024 rows; small inputs get a single full-extent tile.
    bytes_per_row = C * _LANES * cls_pred.dtype.itemsize
    r_cap = max(8, min(1024, (2 * 1024 * 1024) // bytes_per_row))
    r_cap = max(8, (r_cap // 8) * 8)
    if rows <= r_cap:
        r_tile, rows_p = rows, rows
    else:
        r_tile = r_cap
        rows_p = (-(-rows // r_tile)) * r_tile
    HWp = rows_p * _LANES

    cls_flat = cls_pred.reshape(N, C, HW)
    bin_flat = binary_pred.reshape(N, 1, HW)
    tgt_flat = cls_true.reshape(N, 1, HW).astype(jnp.int32)
    pad = HWp - HW
    if pad:
        cls_flat = jnp.pad(cls_flat, ((0, 0), (0, 0), (0, pad)))
        bin_flat = jnp.pad(bin_flat, ((0, 0), (0, 0), (0, pad)))
        tgt_flat = jnp.pad(tgt_flat, ((0, 0), (0, 0), (0, pad)),
                           constant_values=IGNORE_INDEX)

    cls4 = cls_flat.reshape(N, C, rows_p, _LANES)
    bin4 = bin_flat.reshape(N, 1, rows_p, _LANES)
    tgt4 = tgt_flat.reshape(N, 1, rows_p, _LANES)

    n_pix = N * rows_p * _LANES
    cost = pl.CostEstimate(
        flops=n_pix * (8 * C + 16),
        transcendentals=n_pix * (C + 5),
        bytes_accessed=n_pix * (C * cls4.dtype.itemsize
                                + bin4.dtype.itemsize + 4 + 4),
    )

    losses = pl.pallas_call(
        _joint_nll_kernel,
        out_shape=jax.ShapeDtypeStruct((N, rows_p, _LANES), jnp.float32),
        grid=(N, rows_p // r_tile),
        in_specs=[
            pl.BlockSpec((1, C, r_tile, _LANES), lambda n, r: (n, 0, r, 0)),
            pl.BlockSpec((1, 1, r_tile, _LANES), lambda n, r: (n, 0, r, 0)),
            pl.BlockSpec((1, 1, r_tile, _LANES), lambda n, r: (n, 0, r, 0)),
        ],
        out_specs=pl.BlockSpec((1, r_tile, _LANES), lambda n, r: (n, r, 0)),
        compiler_params=pltpu.CompilerParams(
            dimension_semantics=("parallel", "parallel"),
            vmem_limit_bytes=32 * 1024 * 1024),
        cost_estimate=cost,
    )(cls4, bin4, tgt4)

    # ---- SOM reduction (exact, threshold-based; no full sort) ----
    num_inst = N * H * W                          # loss.numel() in PyTorch
    k = int(ratio * num_inst)
    if k <= 0:
        return jnp.float32(0.0)                   # torch.topk(0) -> 0 / 1e-6

    loss_flat = losses.reshape(-1)                # padded pixels contribute 0
    kth = _kth_largest(loss_flat, k)
    gt = loss_flat > kth
    count_gt = jnp.sum(gt.astype(jnp.int32)).astype(jnp.float32)
    sum_gt = jnp.sum(jnp.where(gt, loss_flat, 0.0))
    top_sum = sum_gt + (jnp.float32(k) - count_gt) * kth     # ties at kth
    nonzero = jnp.sum((loss_flat != 0.0).astype(jnp.int32)).astype(jnp.float32)
    total = jnp.sum(loss_flat)
    # kth > 0: exactly k (all nonzero) selected; kth == 0: only nonzero ones.
    return jnp.where(kth > 0.0,
                     top_sum / (k + 1e-6),
                     total / (nonzero + 1e-6))


def joint_loss_som_reference(cls_pred, binary_pred, cls_true, ratio=RATIO):
    """Pure-JAX mirror of the PyTorch module (for verification only)."""
    fgp = jax.nn.sigmoid(binary_pred)                        # (N,1,H,W)
    clsp = jax.nn.softmax(cls_pred, axis=1)                  # (N,C,H,W)
    joint = jnp.concatenate(
        [(1.0 - fgp) * clsp[:, :1], fgp * clsp[:, 1:]], axis=1)
    z = jnp.sum(joint, axis=1, keepdims=True)
    logp = jnp.log(joint / z)
    valid = cls_true != IGNORE_INDEX
    safe_tgt = jnp.where(valid, cls_true, 0)
    picked = jnp.take_along_axis(logp, safe_tgt[:, None], axis=1)[:, 0]
    losses = jnp.where(valid, -picked, 0.0)
    flat = losses.reshape(-1)
    k = int(ratio * flat.size)
    top, _ = jax.lax.top_k(flat, k)
    mask = top != 0
    return jnp.sum(jnp.where(mask, top, 0.0)) / (jnp.sum(mask) + 1e-6)


if __name__ == "__main__":
    key = jax.random.PRNGKey(0)
    k1, k2, k3, k4 = jax.random.split(key, 4)

    N, C, H, W = 2, 4, 16, 16
    cls_pred = jax.random.normal(k1, (N, C, H, W), dtype=jnp.float32)
    binary_pred = jax.random.normal(k2, (N, 1, H, W), dtype=jnp.float32)
    cls_true = jax.random.randint(k3, (N, H, W), 0, C, dtype=jnp.int32)
    # sprinkle some ignore_index pixels
    ignore_mask = jax.random.uniform(k4, (N, H, W)) < 0.1
    cls_true = jnp.where(ignore_mask, IGNORE_INDEX, cls_true)

    out = joint_loss_som(cls_pred, binary_pred, cls_true, ratio=RATIO)
    jax.block_until_ready(out)

    ref = joint_loss_som_reference(cls_pred, binary_pred, cls_true, RATIO)
    if not jnp.allclose(out, ref, rtol=1e-3, atol=1e-4):
        raise SystemExit(f"mismatch: kernel={float(out)} reference={float(ref)}")
    print("KERNEL_OK")
</pallas_src>

<mosaic_0001>
module attributes {stable_mosaic.version = 11 : i64} {
  func.func @_joint_nll_kernel(%arg0: i32, %arg1: i32, %arg2: memref<1x4x2x128xf32, #tpu.memory_space<vmem>>, %arg3: memref<1x1x2x128xf32, #tpu.memory_space<vmem>>, %arg4: memref<1x1x2x128xi32, #tpu.memory_space<vmem>>, %arg5: memref<1x2x128xf32, #tpu.memory_space<vmem>>) attributes {dimension_semantics = [#tpu.dimension_semantics<parallel>, #tpu.dimension_semantics<parallel>], iteration_bounds = array<i64: 2, 1>, scalar_prefetch = 0 : i64, scratch_operands = 0 : i64, tpu.core_type = #tpu.core_type<tc>, window_params = [{transform_indices = @transform_0, window_bounds = array<i64: 1, 4, 2, 128>}, {transform_indices = @transform_1, window_bounds = array<i64: 1, 1, 2, 128>}, {transform_indices = @transform_2, window_bounds = array<i64: 1, 1, 2, 128>}, {transform_indices = @transform_3, window_bounds = array<i64: 1, 2, 128>}]} {
    %c0 = arith.constant 0 : index
    %c0_0 = arith.constant 0 : index
    %c0_1 = arith.constant 0 : index
    %c0_2 = arith.constant 0 : index
    %0 = vector.load %arg3[%c0, %c0_0, %c0_1, %c0_2] : memref<1x1x2x128xf32, #tpu.memory_space<vmem>>, vector<1x1x2x128xf32>
    %1 = vector.shape_cast %0 : vector<1x1x2x128xf32> to vector<2x128xf32>
    %c0_3 = arith.constant 0 : index
    %c0_4 = arith.constant 0 : index
    %c0_5 = arith.constant 0 : index
    %c0_6 = arith.constant 0 : index
    %2 = vector.load %arg4[%c0_3, %c0_4, %c0_5, %c0_6] : memref<1x1x2x128xi32, #tpu.memory_space<vmem>>, vector<1x1x2x128xi32>
    %3 = vector.shape_cast %2 : vector<1x1x2x128xi32> to vector<2x128xi32>
    %c0_7 = arith.constant 0 : index
    %c0_8 = arith.constant 0 : index
    %c0_9 = arith.constant 0 : index
    %c0_10 = arith.constant 0 : index
    %4 = vector.load %arg2[%c0_7, %c0_8, %c0_9, %c0_10] : memref<1x4x2x128xf32, #tpu.memory_space<vmem>>, vector<1x1x2x128xf32>
    %5 = vector.shape_cast %4 : vector<1x1x2x128xf32> to vector<2x128xf32>
    %c0_11 = arith.constant 0 : index
    %c1 = arith.constant 1 : index
    %c0_12 = arith.constant 0 : index
    %c0_13 = arith.constant 0 : index
    %6 = vector.load %arg2[%c0_11, %c1, %c0_12, %c0_13] : memref<1x4x2x128xf32, #tpu.memory_space<vmem>>, vector<1x1x2x128xf32>
    %7 = vector.shape_cast %6 : vector<1x1x2x128xf32> to vector<2x128xf32>
    %8 = arith.maximumf %5, %7 : vector<2x128xf32>
    %c0_14 = arith.constant 0 : index
    %c2 = arith.constant 2 : index
    %c0_15 = arith.constant 0 : index
    %c0_16 = arith.constant 0 : index
    %9 = vector.load %arg2[%c0_14, %c2, %c0_15, %c0_16] : memref<1x4x2x128xf32, #tpu.memory_space<vmem>>, vector<1x1x2x128xf32>
    %10 = vector.shape_cast %9 : vector<1x1x2x128xf32> to vector<2x128xf32>
    %11 = arith.maximumf %8, %10 : vector<2x128xf32>
    %c0_17 = arith.constant 0 : index
    %c3 = arith.constant 3 : index
    %c0_18 = arith.constant 0 : index
    %c0_19 = arith.constant 0 : index
    %12 = vector.load %arg2[%c0_17, %c3, %c0_18, %c0_19] : memref<1x4x2x128xf32, #tpu.memory_space<vmem>>, vector<1x1x2x128xf32>
    %13 = vector.shape_cast %12 : vector<1x1x2x128xf32> to vector<2x128xf32>
    %14 = arith.maximumf %11, %13 : vector<2x128xf32>
    %cst = arith.constant 0.000000e+00 : f32
    %15 = vector.broadcast %cst : f32 to vector<2x128xf32>
    %16 = arith.minimumf %1, %15 : vector<2x128xf32>
    %17 = math.absf %1 : vector<2x128xf32>
    %cst_20 = arith.constant 0.000000e+00 : f32
    %18 = vector.broadcast %cst_20 : f32 to vector<2x128xf32>
    %19 = arith.subf %18, %17 : vector<2x128xf32>
    %20 = math.exp %19 : vector<2x128xf32>
    %cst_21 = arith.constant 1.000000e+00 : f32
    %21 = vector.broadcast %cst_21 : f32 to vector<2x128xf32>
    %22 = arith.addf %21, %20 : vector<2x128xf32>
    %23 = math.log %22 : vector<2x128xf32>
    %24 = arith.subf %16, %23 : vector<2x128xf32>
    %cst_22 = arith.constant 0.000000e+00 : f32
    %25 = vector.broadcast %cst_22 : f32 to vector<2x128xf32>
    %26 = arith.subf %25, %1 : vector<2x128xf32>
    %cst_23 = arith.constant 0.000000e+00 : f32
    %27 = vector.broadcast %cst_23 : f32 to vector<2x128xf32>
    %28 = arith.minimumf %26, %27 : vector<2x128xf32>
    %29 = math.absf %26 : vector<2x128xf32>
    %cst_24 = arith.constant 0.000000e+00 : f32
    %30 = vector.broadcast %cst_24 : f32 to vector<2x128xf32>
    %31 = arith.subf %30, %29 : vector<2x128xf32>
    %32 = math.exp %31 : vector<2x128xf32>
    %cst_25 = arith.constant 1.000000e+00 : f32
    %33 = vector.broadcast %cst_25 : f32 to vector<2x128xf32>
    %34 = arith.addf %33, %32 : vector<2x128xf32>
    %35 = math.log %34 : vector<2x128xf32>
    %36 = arith.subf %28, %35 : vector<2x128xf32>
    %37 = math.exp %24 : vector<2x128xf32>
    %38 = math.exp %36 : vector<2x128xf32>
    %c0_26 = arith.constant 0 : index
    %c0_27 = arith.constant 0 : index
    %c0_28 = arith.constant 0 : index
    %c0_29 = arith.constant 0 : index
    %39 = vector.load %arg2[%c0_26, %c0_27, %c0_28, %c0_29] : memref<1x4x2x128xf32, #tpu.memory_space<vmem>>, vector<1x1x2x128xf32>
    %40 = vector.shape_cast %39 : vector<1x1x2x128xf32> to vector<2x128xf32>
    %41 = arith.subf %40, %14 : vector<2x128xf32>
    %42 = math.exp %41 : vector<2x128xf32>
    %cst_30 = arith.constant 0.000000e+00 : f32
    %43 = vector.broadcast %cst_30 : f32 to vector<2x128xf32>
    %c0_i32 = arith.constant 0 : i32
    %44 = vector.broadcast %c0_i32 : i32 to vector<2x128xi32>
    %45 = arith.cmpi eq, %3, %44 : vector<2x128xi32>
    %cst_31 = arith.constant 0.000000e+00 : f32
    %46 = vector.broadcast %cst_31 : f32 to vector<2x128xf32>
    %47 = arith.select %45, %40, %46 : vector<2x128xi1>, vector<2x128xf32>
    %c0_32 = arith.constant 0 : index
    %c1_33 = arith.constant 1 : index
    %c0_34 = arith.constant 0 : index
    %c0_35 = arith.constant 0 : index
    %48 = vector.load %arg2[%c0_32, %c1_33, %c0_34, %c0_35] : memref<1x4x2x128xf32, #tpu.memory_space<vmem>>, vector<1x1x2x128xf32>
    %49 = vector.shape_cast %48 : vector<1x1x2x128xf32> to vector<2x128xf32>
    %50 = arith.subf %49, %14 : vector<2x128xf32>
    %51 = math.exp %50 : vector<2x128xf32>
    %52 = arith.addf %43, %51 : vector<2x128xf32>
    %c1_i32 = arith.constant 1 : i32
    %53 = vector.broadcast %c1_i32 : i32 to vector<2x128xi32>
    %54 = arith.cmpi eq, %3, %53 : vector<2x128xi32>
    %55 = arith.select %54, %49, %47 : vector<2x128xi1>, vector<2x128xf32>
    %c0_36 = arith.constant 0 : index
    %c2_37 = arith.constant 2 : index
    %c0_38 = arith.constant 0 : index
    %c0_39 = arith.constant 0 : index
    %56 = vector.load %arg2[%c0_36, %c2_37, %c0_38, %c0_39] : memref<1x4x2x128xf32, #tpu.memory_space<vmem>>, vector<1x1x2x128xf32>
    %57 = vector.shape_cast %56 : vector<1x1x2x128xf32> to vector<2x128xf32>
    %58 = arith.subf %57, %14 : vector<2x128xf32>
    %59 = math.exp %58 : vector<2x128xf32>
    %60 = arith.addf %52, %59 : vector<2x128xf32>
    %c2_i32 = arith.constant 2 : i32
    %61 = vector.broadcast %c2_i32 : i32 to vector<2x128xi32>
    %62 = arith.cmpi eq, %3, %61 : vector<2x128xi32>
    %63 = arith.select %62, %57, %55 : vector<2x128xi1>, vector<2x128xf32>
    %c0_40 = arith.constant 0 : index
    %c3_41 = arith.constant 3 : index
    %c0_42 = arith.constant 0 : index
    %c0_43 = arith.constant 0 : index
    %64 = vector.load %arg2[%c0_40, %c3_41, %c0_42, %c0_43] : memref<1x4x2x128xf32, #tpu.memory_space<vmem>>, vector<1x1x2x128xf32>
    %65 = vector.shape_cast %64 : vector<1x1x2x128xf32> to vector<2x128xf32>
    %66 = arith.subf %65, %14 : vector<2x128xf32>
    %67 = math.exp %66 : vector<2x128xf32>
    %68 = arith.addf %60, %67 : vector<2x128xf32>
    %c3_i32 = arith.constant 3 : i32
    %69 = vector.broadcast %c3_i32 : i32 to vector<2x128xi32>
    %70 = arith.cmpi eq, %3, %69 : vector<2x128xi32>
    %71 = arith.select %70, %65, %63 : vector<2x128xi1>, vector<2x128xf32>
    %72 = arith.mulf %38, %42 : vector<2x128xf32>
    %73 = arith.mulf %37, %68 : vector<2x128xf32>
    %74 = arith.addf %72, %73 : vector<2x128xf32>
    %c0_i32_44 = arith.constant 0 : i32
    %75 = vector.broadcast %c0_i32_44 : i32 to vector<2x128xi32>
    %76 = arith.cmpi eq, %3, %75 : vector<2x128xi32>
    %77 = arith.select %76, %36, %24 : vector<2x128xi1>, vector<2x128xf32>
    %78 = arith.subf %71, %14 : vector<2x128xf32>
    %79 = arith.addf %78, %77 : vector<2x128xf32>
    %80 = math.log %74 : vector<2x128xf32>
    %81 = arith.subf %79, %80 : vector<2x128xf32>
    %c255_i32 = arith.constant 255 : i32
    %82 = vector.broadcast %c255_i32 : i32 to vector<2x128xi32>
    %83 = arith.cmpi ne, %3, %82 : vector<2x128xi32>
    %c0_i32_45 = arith.constant 0 : i32
    %84 = vector.broadcast %c0_i32_45 : i32 to vector<2x128xi32>
    %85 = arith.cmpi sge, %3, %84 : vector<2x128xi32>
    %86 = arith.andi %83, %85 : vector<2x128xi1>
    %c4_i32 = arith.constant 4 : i32
    %87 = vector.broadcast %c4_i32 : i32 to vector<2x128xi32>
    %88 = arith.cmpi slt, %3, %87 : vector<2x128xi32>
    %89 = arith.andi %86, %88 : vector<2x128xi1>
    %cst_46 = arith.constant 0.000000e+00 : f32
    %90 = vector.broadcast %cst_46 : f32 to vector<2x128xf32>
    %91 = arith.subf %90, %81 : vector<2x128xf32>
    %cst_47 = arith.constant 0.000000e+00 : f32
    %92 = vector.broadcast %cst_47 : f32 to vector<2x128xf32>
    %93 = arith.maximumf %91, %92 : vector<2x128xf32>
    %cst_48 = arith.constant 0.000000e+00 : f32
    %94 = vector.broadcast %cst_48 : f32 to vector<2x128xf32>
    %95 = arith.select %89, %93, %94 : vector<2x128xi1>, vector<2x128xf32>
    %c0_49 = arith.constant 0 : index
    %c0_50 = arith.constant 0 : index
    %c0_51 = arith.constant 0 : index
    %96 = vector.load %arg5[%c0_49, %c0_50, %c0_51] : memref<1x2x128xf32, #tpu.memory_space<vmem>>, vector<1x2x128xf32>
    %97 = vector.shape_cast %96 : vector<1x2x128xf32> to vector<2x128xf32>
    %98 = vector.shape_cast %95 : vector<2x128xf32> to vector<1x2x128xf32>
    tpu.vector_store %arg5[%c0_49, %c0_50, %c0_51], %98 {strides = array<i32>} : memref<1x2x128xf32, #tpu.memory_space<vmem>>, vector<1x2x128xf32>,
    return
  }
  func.func @transform_0(%arg0: i32, %arg1: i32) -> (i32, i32, i32, i32) {
    %c0_i32 = arith.constant 0 : i32
    %c0_i32_0 = arith.constant 0 : i32
    %c0_i32_1 = arith.constant 0 : i32
    return %arg0, %c0_i32, %arg1, %c0_i32_0 : i32, i32, i32, i32
  }
  func.func @transform_1(%arg0: i32, %arg1: i32) -> (i32, i32, i32, i32) {
    %c0_i32 = arith.constant 0 : i32
    %c0_i32_0 = arith.constant 0 : i32
    %c0_i32_1 = arith.constant 0 : i32
    return %arg0, %c0_i32, %arg1, %c0_i32_0 : i32, i32, i32, i32
  }
  func.func @transform_2(%arg0: i32, %arg1: i32) -> (i32, i32, i32, i32) {
    %c0_i32 = arith.constant 0 : i32
    %c0_i32_0 = arith.constant 0 : i32
    %c0_i32_1 = arith.constant 0 : i32
    return %arg0, %c0_i32, %arg1, %c0_i32_0 : i32, i32, i32, i32
  }
  func.func @transform_3(%arg0: i32, %arg1: i32) -> (i32, i32, i32) {
    %c0_i32 = arith.constant 0 : i32
    %c0_i32_0 = arith.constant 0 : i32
    return %arg0, %arg1, %c0_i32 : i32, i32, i32
  }
}

</mosaic_0001>

<bundles_post_ra>
// kernel: joint_loss_som.1
= control target key start
LH: loop header
LB: loop body
LE: loop exit
PB: predicated region body
PF: predicated region fallthrough
CT: control target
= control target key end

     0   :  { %s545_s12 = smov 0   ;;  %s547_s13 = smov 0   ;;  %s591_s0 = inlined_call_operand.vmem [shape: f32[2,4,2,128], index: 0, kind: input, shape index: {}]   ;;  %s592_s1 = inlined_call_operand.vmem [shape: f32[2,1,2,128], index: 1, kind: input, shape index: {}]   ;;  %s593_s2 = inlined_call_operand.vmem [shape: s32[2,1,2,128], index: 2, kind: input, shape index: {}]   ;;  %s594_s3 = inlined_call_operand.vmem [shape: f32[2,2,128], index: 3, kind: output, shape index: {}]  }
   0x1   :  { %s549_s14 = smov 0  }
   0x2 LB: > { %s25_s15 = sadd.s32 1, %s519_s13  ;;  %p443_p0 = scmp.ge.s32.totalorder %s523_s14, 1  ;;  %s523_s14 = sphi %s549_s14, %s13_s14   ;;  %s519_s13 = sphi %s547_s13, %s596_s13   ;;  %s515_s12 = sphi %s545_s12, %s595_s12  }
   0x3   : > { %p27_p1 = scmp.ge.s32.totalorder %s25_s15, 2  ;;  %p184_p2 = scmp.lt.s32.totalorder %s523_s14, 3 }
   0x5   : > { %s598_s15 = smov (%p27_p1, %s25_s15), 0  ;;  %p185_p3 = pnand %p443_p0, %p184_p2 }
   0x6   : > { %p227_p4 = scmp.lt.s32.totalorder (!%p185_p3), %s515_s12, 1 }
   0x7   : > { %188 = sbr.rel (%p185_p3) target bundleno = 92 (0x5c), region = 32 }
   0xe   : > { %s600_s12 = smov (!%p227_p4, %s515_s12), 1 }
   0xf   : > { %s454_s16 = sshll.u32 %s600_s12, 3  ;;  %s563_s17 = sshll.u32 %s600_s12, 1 }
  0x10   : > { %s241_s20 = scalar_lea.vmem %s592_s1, %s563_s17  ;;  %s234_s23 = scalar_lea.vmem %s591_s0, %s454_s16 }
  0x11   : > { %v256_v0 = vld [vmem:[%s241_s20] sm:$0x3]  ;;  %v449_v4 = vld [vmem:[%s234_s23 + $0x2] sm:$0x3]  ;;  %v450_v10 = vld [vmem:[%s234_s23 + $0x4] sm:$0x3]  ;;  %s248_s26 = scalar_lea.vmem %s593_s2, %s563_s17  ;;  %s255_s29 = scalar_lea.vmem %s594_s3, %s563_s17 }
  0x12   : > { %v269_v1 = vand.u32 2147483647, %v256_v0  ;;  %v277_v2 = vsub.f32 0.0, %v256_v0  ;;  %v258_v3 = vld [vmem:[%s234_s23] sm:$0x3]  ;;  %v268_v26 = vmin.f32 %v256_v0, 0.0 }
  0x13   : > { %v261_v9 = vmax.f32 %v258_v3, %v449_v4  ;;  %v451_v13 = vld [vmem:[%s234_s23 + $0x6] sm:$0x3]  ;;  %v257_v41 = vld [vmem:[%s248_s26] sm:$0x3] }
  0x14   : > { %v270_v5 = vsub.f32 0.0, %v269_v1  ;;  %v279_v6 = vand.u32 2147483647, %v277_v2  ;;  %v278_v29 = vmin.f32 %v277_v2, 0.0  ;;  %vm294_vm0 = vcmp.eq.s32.totalorder %v257_v41, 0 }
  0x15   : > { %v264_v12 = vmax.f32 %v261_v9, %v450_v10  ;;  %v295_v45 = vsel %vm294_vm0, %v258_v3, 0.0  ;;  %vm300_vm1 = vcmp.eq.s32.totalorder %v257_v41, 1  ;;  %vm306_vm2 = vcmp.eq.s32.totalorder %v257_v41, 2 }
  0x16   : > { %v271_v7 = vmul.f32 1.442695, %v270_v5  ;;  %v280_v8 = vsub.f32 0.0, %v279_v6  ;;  %v301_v48 = vsel %vm300_vm1, %v449_v4, %v295_v45  ;;  %vm312_vm3 = vcmp.eq.s32.totalorder %v257_v41, 3 }
  0x17   : > { %v267_v14 = vmax.f32 %v264_v12, %v451_v13  ;;  %v307_v51 = vsel %vm306_vm2, %v450_v10, %v301_v48  ;;  %vm323_vm4 = vcmp.ne.s32.totalorder %v257_v41, 255  ;;  %vm324_vm5 = vcmp.ge.s32.totalorder %v257_v41, 0 }
  0x18   : > { %479 = vpow2.f32 %v271_v7  ;;  %v281_v11 = vmul.f32 1.442695, %v280_v8  ;;  %v313_v52 = vsel %vm312_vm3, %v451_v13, %v307_v51  ;;  %vm325_vm6 = vmand %vm323_vm4, %vm324_vm5  ;;  %vm326_vm7 = vcmp.lt.s32.totalorder %v257_v41, 4 }
  0x19   : > { %v296_v17 = vsub.f32 %v449_v4, %v267_v14  ;;  %v302_v19 = vsub.f32 %v450_v10, %v267_v14  ;;  %v308_v23 = vsub.f32 %v451_v13, %v267_v14  ;;  %v291_v25 = vsub.f32 %v258_v3, %v267_v14  ;;  %vm327_vm8 = vmand %vm325_vm6, %vm326_vm7 }
  0x1a   : > { %481 = vpow2.f32 %v281_v11  ;;  %v318_v53 = vsub.f32 %v313_v52, %v267_v14 }
  0x1b   : > { %v297_v21 = vmul.f32 1.442695, %v296_v17  ;;  %v303_v22 = vmul.f32 1.442695, %v302_v19  ;;  %v309_v24 = vmul.f32 1.442695, %v308_v23 }
  0x1c   : > { %v292_v31 = vmul.f32 1.442695, %v291_v25 }
  0x22   : > { %v480_v15 = vpop.eup %479 }
  0x23   : > { %v273_v16 = vadd.f32 1.0, %v480_v15 }
  0x24   : > { %v482_v18 = vpop.eup %481 }
  0x25   : > { %483 = vlog2.f32 %v273_v16  ;;  %v283_v20 = vadd.f32 1.0, %v482_v18 }
  0x27   : > { %485 = vlog2.f32 %v283_v20 }
  0x28   : > { %487 = vpow2.f32 %v297_v21 }
  0x29   : > { %489 = vpow2.f32 %v303_v22 }
  0x2a   : > { %491 = vpow2.f32 %v309_v24 }
  0x2b   : > { %493 = vpow2.f32 %v292_v31 }
  0x2f   : > { %v484_v27 = vpop.eup %483 }
  0x30   : > { %v275_v28 = vmul.f32 0.6931472, %v484_v27 }
  0x31   : > { %v486_v30 = vpop.eup %485 }
  0x32   : > { %v276_v32 = vsub.f32 %v268_v26, %v275_v28  ;;  %v285_v33 = vmul.f32 0.6931472, %v486_v30  ;;  %v488_v36 = vpop.eup %487 }
  0x33   : > { %v490_v37 = vpop.eup %489 }
  0x34   : > { %v286_v34 = vsub.f32 %v278_v29, %v285_v33  ;;  %v287_v35 = vmul.f32 1.442695, %v276_v32  ;;  %v305_v39 = vadd.f32 %v490_v37, %v488_v36  ;;  %v492_v40 = vpop.eup %491 }
  0x35   : > { %v494_v43 = vpop.eup %493 }
  0x36   : > { %495 = vpow2.f32 %v287_v35  ;;  %v289_v38 = vmul.f32 1.442695, %v286_v34  ;;  %v311_v42 = vadd.f32 %v492_v40, %v305_v39  ;;  %v317_v54 = vsel %vm294_vm0, %v286_v34, %v276_v32 }
  0x37   : > { %v319_v55 = vadd.f32 %v318_v53, %v317_v54 }
  0x38   : > { %497 = vpow2.f32 %v289_v38 }
  0x40   : > { %v496_v44 = vpop.eup %495 }
  0x41   : > { %v315_v46 = vmul.f32 %v496_v44, %v311_v42 }
  0x42   : > { %v498_v47 = vpop.eup %497 }
  0x43   : > { %v314_v49 = vmul.f32 %v498_v47, %v494_v43 }
  0x45   : > { %v316_v50 = vadd.f32 %v315_v46, %v314_v49 }
  0x47   : > { %499 = vlog2.f32 %v316_v50 }
  0x51   : > { %v500_v56 = vpop.eup %499 }
  0x52   : > { %v321_v57 = vmul.f32 0.6931472, %v500_v56 }
  0x54   : > { %v322_v58 = vsub.f32 %v319_v55, %v321_v57 }
  0x56   : > { %v328_v59 = vsub.f32 0.0, %v322_v58 }
  0x58   : > { %v329_v60 = vmax.f32 %v328_v59, 0.0 }
  0x5a   : > { %v330_v61 = vsel %vm327_vm8, %v329_v60, 0.0 }
  0x5b   : > { %331 = vst [vmem:[%s255_s29] sm:$0x3] %v330_v61 }
  0x5c PF: > { %s13_s14 = sadd.s32 1, %s523_s14   ;;  %s595_s12 = smov %s519_s13 }
  0x5d   : > { %p10_p5 = scmp.ge.s32.totalorder %s13_s14, 4   ;;  %s596_s13 = smov %s598_s15 }
  0x5f   :  { %12 = sbr.rel (!%p10_p5) target bundleno = 2 (0x2), region = 71 }

</bundles_post_ra>
